<compile_context>
chip_gen: v7x
topology: tpu7x:2x2x1
jax: 0.10.0
libtpu: 0.0.40
codegen_flags: <defaults>
</compile_context>

<pallas_src>
import functools

import jax
import jax.numpy as jnp
from jax.experimental import pallas as pl
from jax.experimental.pallas import tpu as pltpu

LANE = 128                      # vreg lane width  -> feature padding
PACK = 16                       # bf16 sublane packing -> contraction padding
MAX_K_RESIDENT = 2048           # above this, split the contraction axis
K_TILE = 512                    # K tile when the contraction axis is split


# --------------------------------------------------------------------------
# helpers
# --------------------------------------------------------------------------
def _round_up(v, m):
    return (v + m - 1) // m * m


def _pad2d(a, rows, cols, dtype):
    out = jnp.zeros((rows, cols), dtype)
    return out.at[: a.shape[0], : a.shape[1]].set(a.astype(dtype))


def _tpu_vmem_capacity():
    try:
        return int(pltpu.get_tpu_info().vmem_capacity_bytes)
    except Exception:  # fall back to the smallest current generation (v7x)
        return 64 * 1024 * 1024


def _masked_log_softmax(h, valid_cols):
    """log_softmax over axis 1 restricted to the first `valid_cols` columns."""
    col = jax.lax.broadcasted_iota(jnp.int32, h.shape, 1)
    neg = jnp.float32(-1e30)
    hm = jnp.where(col < valid_cols, h, neg)
    m = jnp.max(hm, axis=1, keepdims=True)
    s = hm - m
    lse = jnp.log(jnp.sum(jnp.exp(s), axis=1, keepdims=True))
    return s - lse


# --------------------------------------------------------------------------
# kernels
# --------------------------------------------------------------------------
def _gcn_fused_kernel(a_ref, x_ref, w1_ref, b1_ref, w2_ref, b2_ref,
                      w3_ref, b3_ref, o_ref, *, valid_cols):
    """Small-graph path: all three layers fused, everything VMEM resident."""
    a = a_ref[...]                                              # bf16 [Ns, Ns]

    # layer 1 (dropout == identity in eval mode)
    h = jnp.dot(x_ref[...], w1_ref[...], preferred_element_type=jnp.float32)
    h = jnp.dot(a, h.astype(jnp.bfloat16),
                preferred_element_type=jnp.float32) + b1_ref[...]
    h = jnp.maximum(h, 0.0).astype(jnp.bfloat16)

    # layer 2
    h = jnp.dot(h, w2_ref[...], preferred_element_type=jnp.float32)
    h = jnp.dot(a, h.astype(jnp.bfloat16),
                preferred_element_type=jnp.float32) + b2_ref[...]
    h = jnp.maximum(h, 0.0).astype(jnp.bfloat16)

    # layer 3
    h = jnp.dot(h, w3_ref[...], preferred_element_type=jnp.float32)
    h = jnp.dot(a, h.astype(jnp.bfloat16),
                preferred_element_type=jnp.float32) + b3_ref[...]

    o_ref[...] = _masked_log_softmax(h, valid_cols)


def _xw_kernel(x_ref, w_ref, o_ref):
    """H0 = X @ W computed ONCE per layer (hoisted out of the row-tiled grid)."""
    o_ref[...] = jnp.dot(x_ref[...], w_ref[...],
                         preferred_element_type=jnp.float32).astype(o_ref.dtype)


def _agg_kernel(a_ref, h_ref, b_ref, o_ref, acc_ref, *, activation, valid_cols):
    """out[row_tile] = sum_k A[row_tile, k_tile] @ H0[k_tile] (+ b, act)."""
    k = pl.program_id(1)

    @pl.when(k == 0)
    def _():
        acc_ref[...] = jnp.zeros_like(acc_ref)

    acc_ref[...] += jnp.dot(a_ref[...], h_ref[...],
                            preferred_element_type=jnp.float32)

    @pl.when(k == pl.num_programs(1) - 1)
    def _():
        h = acc_ref[...] + b_ref[...]
        if activation == "relu":
            o_ref[...] = jnp.maximum(h, 0.0).astype(o_ref.dtype)
        else:  # final layer: masked log_softmax over the real output columns
            o_ref[...] = _masked_log_softmax(h, valid_cols).astype(o_ref.dtype)


# --------------------------------------------------------------------------
# pallas_call wrappers
# --------------------------------------------------------------------------
def _fused_call(a_p, x_p, w1_p, b1_p, w2_p, b2_p, w3_p, b3_p, *,
                valid_cols, vmem_limit):
    n_sq = a_p.shape[0]
    o_pad = w3_p.shape[1]
    vmem = pl.BlockSpec(memory_space=pltpu.MemorySpace.VMEM)
    return pl.pallas_call(
        functools.partial(_gcn_fused_kernel, valid_cols=valid_cols),
        out_shape=jax.ShapeDtypeStruct((n_sq, o_pad), jnp.float32),
        in_specs=[vmem] * 8,
        out_specs=vmem,
        compiler_params=pltpu.CompilerParams(vmem_limit_bytes=vmem_limit),
    )(a_p, x_p, w1_p, b1_p, w2_p, b2_p, w3_p, b3_p)


def _xw_call(x_p, w_p, *, vmem_limit):
    vmem = pl.BlockSpec(memory_space=pltpu.MemorySpace.VMEM)
    return pl.pallas_call(
        _xw_kernel,
        out_shape=jax.ShapeDtypeStruct((x_p.shape[0], w_p.shape[1]),
                                       jnp.bfloat16),
        in_specs=[vmem, vmem],
        out_specs=vmem,
        compiler_params=pltpu.CompilerParams(vmem_limit_bytes=vmem_limit),
    )(x_p, w_p)


def _agg_call(a_p, h_p, b_p, *, tm, tk, activation, valid_cols, out_dtype,
              vmem_limit):
    n_rows, n_k = a_p.shape
    c_pad = h_p.shape[1]
    grid = (n_rows // tm, n_k // tk)
    kernel = functools.partial(_agg_kernel, activation=activation,
                               valid_cols=valid_cols)
    return pl.pallas_call(
        kernel,
        out_shape=jax.ShapeDtypeStruct((n_rows, c_pad), out_dtype),
        grid_spec=pltpu.PrefetchScalarGridSpec(
            num_scalar_prefetch=0,
            grid=grid,
            in_specs=[
                pl.BlockSpec((tm, tk), lambda i, k: (i, k)),     # A row/K tile
                pl.BlockSpec((tk, c_pad), lambda i, k: (k, 0)),  # H0 K slab
                pl.BlockSpec((1, c_pad), lambda i, k: (0, 0)),   # bias
            ],
            out_specs=pl.BlockSpec((tm, c_pad), lambda i, k: (i, 0)),
            scratch_shapes=[pltpu.VMEM((tm, c_pad), jnp.float32)],
        ),
        compiler_params=pltpu.CompilerParams(
            dimension_semantics=("parallel", "arbitrary"),
            vmem_limit_bytes=vmem_limit),
    )(a_p, h_p, b_p)


# --------------------------------------------------------------------------
# graph glue + full forward
# --------------------------------------------------------------------------
def build_normalized_adj(edge_index, num_nodes, rows=None, cols=None,
                         dtype=jnp.float32):
    """Dense D^-1/2 (A + I) D^-1/2 (GCNConv / PyG conventions).

    When rows/cols are given, the adjacency is scattered directly into the
    padded (rows, cols) buffer and cast once (no extra pad copy).
    """
    rows = num_nodes if rows is None else rows
    cols = num_nodes if cols is None else cols
    src, dst = edge_index[0], edge_index[1]
    loops = jnp.arange(num_nodes, dtype=edge_index.dtype)
    row = jnp.concatenate([src, loops])   # message source j
    col = jnp.concatenate([dst, loops])   # message target i
    deg = jnp.zeros((num_nodes,), jnp.float32).at[col].add(1.0)
    dinv = jnp.where(deg > 0, jax.lax.rsqrt(deg), 0.0)
    norm = dinv[row] * dinv[col]
    a_hat = jnp.zeros((rows, cols), jnp.float32).at[col, row].add(norm)
    return a_hat.astype(dtype)


def gcn_forward(x, edge_index, params, *, force_tiled=False):
    """3-layer GCN forward; returns [N, output_dim] f32 log-probabilities."""
    n, in_dim = x.shape
    w1, b1, w2, b2, w3, b3 = params
    hid = w1.shape[1]
    out_dim = w3.shape[1]

    # lane-dense feature/channel padding
    f_pad = _round_up(in_dim, LANE)
    h_pad = _round_up(hid, LANE)
    o_pad = _round_up(out_dim, LANE)

    # generation-aware VMEM budgets (v5e/v6e: 128 MiB, v7x: 64 MiB)
    vmem_cap = _tpu_vmem_capacity()
    vmem_limit = min(vmem_cap * 3 // 4, 64 * 1024 * 1024)
    fused_budget = min(vmem_limit // 2, 32 * 1024 * 1024)

    w1_p = _pad2d(w1, f_pad, h_pad, jnp.bfloat16)
    w2_p = _pad2d(w2, h_pad, h_pad, jnp.bfloat16)
    w3_p = _pad2d(w3, h_pad, o_pad, jnp.bfloat16)
    b1_p = _pad2d(b1, 1, h_pad, jnp.float32)
    b2_p = _pad2d(b2, 1, h_pad, jnp.float32)
    b3_p = _pad2d(b3, 1, o_pad, jnp.float32)

    # ---- fused single-kernel path for small/medium graphs -----------------
    n_sq = _round_up(max(n, PACK), PACK)
    fused_bytes = (n_sq * n_sq * 2 + n_sq * f_pad * 2
                   + (w1_p.size + w2_p.size + w3_p.size) * 2
                   + (b1_p.size + b2_p.size + b3_p.size) * 4
                   + 2 * n_sq * max(h_pad, o_pad) * 4   # f32 intermediates
                   + n_sq * o_pad * 4)                  # f32 output

    if (not force_tiled) and fused_bytes <= fused_budget:
        a_p = build_normalized_adj(edge_index, n, n_sq, n_sq, jnp.bfloat16)
        x_p = _pad2d(x, n_sq, f_pad, jnp.bfloat16)
        out_p = _fused_call(a_p, x_p, w1_p, b1_p, w2_p, b2_p, w3_p, b3_p,
                            valid_cols=out_dim, vmem_limit=vmem_limit)
        return out_p[:n, :out_dim]

    # ---- row-tiled (and K-tiled) per-layer path ----------------------------
    # row tile: pick tm in {128, 256} minimizing padding (ties -> 128, which
    # also gives more grid steps for v7x megacore / smaller per-step DMA).
    tm = min((128, 256), key=lambda t: (_round_up(max(n, t), t), t))
    n_rows = _round_up(max(n, tm), tm)

    # contraction axis (A columns / H rows): only bf16-packing padding unless
    # it is large enough to be worth splitting into K tiles (bounds VMEM).
    n_k16 = _round_up(max(n, PACK), PACK)
    tk = n_k16 if n_k16 <= MAX_K_RESIDENT else K_TILE
    n_k = _round_up(max(n, PACK), tk)

    a_p = build_normalized_adj(edge_index, n, n_rows, n_k, jnp.bfloat16)
    x_k = _pad2d(x, n_k, f_pad, jnp.bfloat16)

    # layer 1
    h0 = _xw_call(x_k, w1_p, vmem_limit=vmem_limit)              # (n_k, h_pad)
    h = _agg_call(a_p, h0, b1_p, tm=tm, tk=tk, activation="relu",
                  valid_cols=hid, out_dtype=jnp.bfloat16, vmem_limit=vmem_limit)
    # layer 2 (only the first n_k rows of h feed the next aggregation)
    h0 = _xw_call(h[:n_k], w2_p, vmem_limit=vmem_limit)
    h = _agg_call(a_p, h0, b2_p, tm=tm, tk=tk, activation="relu",
                  valid_cols=hid, out_dtype=jnp.bfloat16, vmem_limit=vmem_limit)
    # layer 3 + masked log_softmax
    h0 = _xw_call(h[:n_k], w3_p, vmem_limit=vmem_limit)
    out_p = _agg_call(a_p, h0, b3_p, tm=tm, tk=tk, activation="log_softmax",
                      valid_cols=out_dim, out_dtype=jnp.float32,
                      vmem_limit=vmem_limit)
    return out_p[:n, :out_dim]


def gcn_reference(x, edge_index, params):
    """Pure-JAX f32 reference with the same GCNConv semantics."""
    w1, b1, w2, b2, w3, b3 = params
    a = build_normalized_adj(edge_index, x.shape[0])
    h = jnp.maximum(a @ (x @ w1) + b1, 0.0)
    h = jnp.maximum(a @ (h @ w2) + b2, 0.0)
    h = a @ (h @ w3) + b3
    return jax.nn.log_softmax(h, axis=1)


def init_params(key, input_dim, hidden_dim, output_dim):
    """Deterministic Glorot-uniform weights + zero biases (GCNConv defaults)."""
    def glorot(k, fan_in, fan_out):
        limit = (6.0 / (fan_in + fan_out)) ** 0.5
        return jax.random.uniform(k, (fan_in, fan_out), jnp.float32,
                                  minval=-limit, maxval=limit)
    k1, k2, k3 = jax.random.split(key, 3)
    w1 = glorot(k1, input_dim, hidden_dim)
    b1 = jnp.zeros((1, hidden_dim), jnp.float32)
    w2 = glorot(k2, hidden_dim, hidden_dim)
    b2 = jnp.zeros((1, hidden_dim), jnp.float32)
    w3 = glorot(k3, hidden_dim, output_dim)
    b3 = jnp.zeros((1, output_dim), jnp.float32)
    return (w1, b1, w2, b2, w3, b3)


if __name__ == "__main__":
    input_dim, hidden_dim, output_dim = 8, 32, 8

    key = jax.random.PRNGKey(0)
    kp, kx1, ke1, kx2, ke2 = jax.random.split(key, 5)
    params = init_params(kp, input_dim, hidden_dim, output_dim)

    # ---- test 1: tiny graph -> fully fused VMEM-resident kernel ----------
    n1, e1 = 16, 40
    x1 = jax.random.normal(kx1, (n1, input_dim), jnp.float32)
    ei1 = jax.random.randint(ke1, (2, e1), 0, n1, jnp.int32)

    out_fused = gcn_forward(x1, ei1, params)
    out_tiled = gcn_forward(x1, ei1, params, force_tiled=True)
    jax.block_until_ready((out_fused, out_tiled))

    ref1 = gcn_reference(x1, ei1, params)
    assert out_fused.shape == (n1, output_dim)
    assert bool(jnp.all(jnp.abs(jnp.sum(jnp.exp(out_fused), axis=1) - 1.0) < 1e-3))
    assert bool(jnp.all(jnp.abs(out_fused - ref1) < 0.15))
    assert bool(jnp.all(jnp.abs(out_fused - out_tiled) < 2e-2))

    # ---- test 2: larger graph -> row-tiled grid (multiple steps) ---------
    n2, e2 = 300, 900
    x2 = jax.random.normal(kx2, (n2, input_dim), jnp.float32)
    ei2 = jax.random.randint(ke2, (2, e2), 0, n2, jnp.int32)

    out2 = gcn_forward(x2, ei2, params, force_tiled=True)
    jax.block_until_ready(out2)

    ref2 = gcn_reference(x2, ei2, params)
    assert out2.shape == (n2, output_dim)
    assert bool(jnp.all(jnp.abs(jnp.sum(jnp.exp(out2), axis=1) - 1.0) < 1e-3))
    assert bool(jnp.all(jnp.abs(out2 - ref2) < 0.15))

    print("KERNEL_OK")
</pallas_src>

<mosaic_0001>
module attributes {stable_mosaic.version = 11 : i64} {
  func.func @_gcn_fused_kernel(%arg0: memref<16x16xbf16, #tpu.memory_space<vmem>>, %arg1: memref<16x128xbf16, #tpu.memory_space<vmem>>, %arg2: memref<128x128xbf16, #tpu.memory_space<vmem>>, %arg3: memref<1x128xf32, #tpu.memory_space<vmem>>, %arg4: memref<128x128xbf16, #tpu.memory_space<vmem>>, %arg5: memref<1x128xf32, #tpu.memory_space<vmem>>, %arg6: memref<128x128xbf16, #tpu.memory_space<vmem>>, %arg7: memref<1x128xf32, #tpu.memory_space<vmem>>, %arg8: memref<16x128xf32, #tpu.memory_space<vmem>>) attributes {dimension_semantics = [], scalar_prefetch = 0 : i64, scratch_operands = 0 : i64, tpu.core_type = #tpu.core_type<tc>} {
    %c0 = arith.constant 0 : index
    %c0_0 = arith.constant 0 : index
    %0 = vector.load %arg0[%c0, %c0_0] : memref<16x16xbf16, #tpu.memory_space<vmem>>, vector<16x16xbf16>
    %c0_1 = arith.constant 0 : index
    %c0_2 = arith.constant 0 : index
    %1 = vector.load %arg1[%c0_1, %c0_2] : memref<16x128xbf16, #tpu.memory_space<vmem>>, vector<16x128xbf16>
    %c0_3 = arith.constant 0 : index
    %c0_4 = arith.constant 0 : index
    %2 = vector.load %arg2[%c0_3, %c0_4] : memref<128x128xbf16, #tpu.memory_space<vmem>>, vector<128x128xbf16>
    %cst = arith.constant dense<0.000000e+00> : vector<16x128xf32>
    %3 = tpu.matmul %1, %2, %cst {dimension_numbers = #tpu.dot_dimension_numbers<[1], [0], [0], [1], [0, 0, 1, 1], [], []>} : vector<16x128xbf16>, vector<128x128xbf16>, vector<16x128xf32> -> vector<16x128xf32>
    %4 = arith.truncf %3 : vector<16x128xf32> to vector<16x128xbf16>
    %cst_5 = arith.constant dense<0.000000e+00> : vector<16x128xf32>
    %5 = tpu.matmul %0, %4, %cst_5 {dimension_numbers = #tpu.dot_dimension_numbers<[1], [0], [0], [1], [0, 0, 1, 1], [], []>} : vector<16x16xbf16>, vector<16x128xbf16>, vector<16x128xf32> -> vector<16x128xf32>
    %c0_6 = arith.constant 0 : index
    %c0_7 = arith.constant 0 : index
    %6 = vector.load %arg3[%c0_6, %c0_7] : memref<1x128xf32, #tpu.memory_space<vmem>>, vector<1x128xf32>
    %7 = vector.broadcast %6 : vector<1x128xf32> to vector<16x128xf32>
    %8 = arith.addf %5, %7 : vector<16x128xf32>
    %cst_8 = arith.constant 0.000000e+00 : f32
    %9 = vector.broadcast %cst_8 : f32 to vector<16x128xf32>
    %10 = arith.maximumf %8, %9 : vector<16x128xf32>
    %11 = arith.truncf %10 : vector<16x128xf32> to vector<16x128xbf16>
    %c0_9 = arith.constant 0 : index
    %c0_10 = arith.constant 0 : index
    %12 = vector.load %arg4[%c0_9, %c0_10] : memref<128x128xbf16, #tpu.memory_space<vmem>>, vector<128x128xbf16>
    %cst_11 = arith.constant dense<0.000000e+00> : vector<16x128xf32>
    %13 = tpu.matmul %11, %12, %cst_11 {dimension_numbers = #tpu.dot_dimension_numbers<[1], [0], [0], [1], [0, 0, 1, 1], [], []>} : vector<16x128xbf16>, vector<128x128xbf16>, vector<16x128xf32> -> vector<16x128xf32>
    %14 = arith.truncf %13 : vector<16x128xf32> to vector<16x128xbf16>
    %cst_12 = arith.constant dense<0.000000e+00> : vector<16x128xf32>
    %15 = tpu.matmul %0, %14, %cst_12 {dimension_numbers = #tpu.dot_dimension_numbers<[1], [0], [0], [1], [0, 0, 1, 1], [], []>} : vector<16x16xbf16>, vector<16x128xbf16>, vector<16x128xf32> -> vector<16x128xf32>
    %c0_13 = arith.constant 0 : index
    %c0_14 = arith.constant 0 : index
    %16 = vector.load %arg5[%c0_13, %c0_14] : memref<1x128xf32, #tpu.memory_space<vmem>>, vector<1x128xf32>
    %17 = vector.broadcast %16 : vector<1x128xf32> to vector<16x128xf32>
    %18 = arith.addf %15, %17 : vector<16x128xf32>
    %cst_15 = arith.constant 0.000000e+00 : f32
    %19 = vector.broadcast %cst_15 : f32 to vector<16x128xf32>
    %20 = arith.maximumf %18, %19 : vector<16x128xf32>
    %21 = arith.truncf %20 : vector<16x128xf32> to vector<16x128xbf16>
    %c0_16 = arith.constant 0 : index
    %c0_17 = arith.constant 0 : index
    %22 = vector.load %arg6[%c0_16, %c0_17] : memref<128x128xbf16, #tpu.memory_space<vmem>>, vector<128x128xbf16>
    %cst_18 = arith.constant dense<0.000000e+00> : vector<16x128xf32>
    %23 = tpu.matmul %21, %22, %cst_18 {dimension_numbers = #tpu.dot_dimension_numbers<[1], [0], [0], [1], [0, 0, 1, 1], [], []>} : vector<16x128xbf16>, vector<128x128xbf16>, vector<16x128xf32> -> vector<16x128xf32>
    %24 = arith.truncf %23 : vector<16x128xf32> to vector<16x128xbf16>
    %cst_19 = arith.constant dense<0.000000e+00> : vector<16x128xf32>
    %25 = tpu.matmul %0, %24, %cst_19 {dimension_numbers = #tpu.dot_dimension_numbers<[1], [0], [0], [1], [0, 0, 1, 1], [], []>} : vector<16x16xbf16>, vector<16x128xbf16>, vector<16x128xf32> -> vector<16x128xf32>
    %c0_20 = arith.constant 0 : index
    %c0_21 = arith.constant 0 : index
    %26 = vector.load %arg7[%c0_20, %c0_21] : memref<1x128xf32, #tpu.memory_space<vmem>>, vector<1x128xf32>
    %27 = vector.broadcast %26 : vector<1x128xf32> to vector<16x128xf32>
    %28 = arith.addf %25, %27 : vector<16x128xf32>
    %29 = tpu.iota {dimensions = array<i32: 1>} : vector<16x128xi32>
    %c8_i32 = arith.constant 8 : i32
    %30 = vector.broadcast %c8_i32 : i32 to vector<16x128xi32>
    %31 = arith.cmpi slt, %29, %30 : vector<16x128xi32>
    %cst_22 = arith.constant -1.000000e+30 : f32
    %32 = vector.broadcast %cst_22 : f32 to vector<16x128xf32>
    %33 = arith.select %31, %28, %32 : vector<16x128xi1>, vector<16x128xf32>
    %cst_23 = arith.constant dense<0xFF800000> : vector<16xf32>
    %34 = vector.multi_reduction <maximumf>, %33, %cst_23 [1] : vector<16x128xf32> to vector<16xf32>
    %35 = vector.shape_cast %34 : vector<16xf32> to vector<16x1xf32>
    %36 = vector.broadcast %35 : vector<16x1xf32> to vector<16x128xf32>
    %37 = arith.subf %33, %36 : vector<16x128xf32>
    %38 = math.exp %37 : vector<16x128xf32>
    %cst_24 = arith.constant dense<0.000000e+00> : vector<16xf32>
    %39 = vector.multi_reduction <add>, %38, %cst_24 [1] : vector<16x128xf32> to vector<16xf32>
    %40 = vector.shape_cast %39 : vector<16xf32> to vector<16x1xf32>
    %41 = math.log %40 : vector<16x1xf32>
    %42 = vector.broadcast %41 : vector<16x1xf32> to vector<16x128xf32>
    %43 = arith.subf %37, %42 : vector<16x128xf32>
    %c0_25 = arith.constant 0 : index
    %c0_26 = arith.constant 0 : index
    %44 = vector.load %arg8[%c0_25, %c0_26] : memref<16x128xf32, #tpu.memory_space<vmem>>, vector<16x128xf32>
    tpu.vector_store %arg8[%c0_25, %c0_26], %43 {strides = array<i32>} : memref<16x128xf32, #tpu.memory_space<vmem>>, vector<16x128xf32>,
    return
  }
}

</mosaic_0001>

<bundles_post_ra>
// kernel: tpu_custom_call.1
= control target key start
LH: loop header
LB: loop body
LE: loop exit
PB: predicated region body
PF: predicated region fallthrough
CT: control target
= control target key end

     0   :  { %13 = vsyncpa [#allocation3], 0  ;;  %s1175_s0 = inlined_call_operand.hbm [shape: bf16[16,16], index: 0, kind: input, shape index: {}]   ;;  %s1176_s1 = inlined_call_operand.hbm [shape: bf16[16,128], index: 1, kind: input, shape index: {}]   ;;  %s1177_s2 = inlined_call_operand.hbm [shape: bf16[128,128], index: 2, kind: input, shape index: {}]   ;;  %s1178_s3 = inlined_call_operand.vmem [shape: f32[1,128], index: 3, kind: input, shape index: {}]   ;;  %s1179_s4 = inlined_call_operand.hbm [shape: bf16[128,128], index: 4, kind: input, shape index: {}]   ;;  %s1180_s5 = inlined_call_operand.vmem [shape: f32[1,128], index: 5, kind: input, shape index: {}]   ;;  %s1181_s6 = inlined_call_operand.hbm [shape: bf16[128,128], index: 6, kind: input, shape index: {}]   ;;  %s1182_s7 = inlined_call_operand.vmem [shape: f32[1,128], index: 7, kind: input, shape index: {}]   ;;  %s1183_s8 = inlined_call_operand.hbm [shape: f32[16,128], index: 8, kind: output, shape index: {}]  }
   0x1   :  { %14 = vsyncpa [#allocation6], 0 }
   0x2   :  { %15 = vsyncpa [#allocation9], 0 }
   0x3   :  { %16 = vsyncpa [#allocation4], 0  ;;  %s961_s27 = smov [#allocation5]   ;;  %s962_s29 = smov [#allocation8]  }
   0x4   :  { %s34_s28 = sshll.u32 %s961_s27, 4  ;;  %s60_s30 = sshll.u32 %s962_s29, 4  ;;  %s35_s28 = int_to_ptr.vmem [resolvable:$true] %s34_s28  ;;  %s1018_s30 = int_to_ptr.vmem [resolvable:$true] %s60_s30 }
   0x5   :  { %s821_s11 = scalar_lea.hbm %s1176_s1, 128 }
   0x6   :  { %p822_p0 = scmp.ne.s32.totalorder %s1176_s1, %s821_s11  ;;  %p825_p1 = scmp.lt.u32.totalorder %s821_s11, %s1176_s1 }
   0x8   :  { %p827_p2 = pnand %p825_p1, %p822_p0 }
   0xa   :  { %830 = shalt.err (!%p827_p2)
}
   0xb   :  { %s831_s16 = scalar_lea.vmem %s35_s28, 128  ;;  %p836_p4 = scmp.lt.s32.totalorder %s35_s28, %s35_s28 }
   0xc   :  { %p832_p3 = scmp.ne.s32.totalorder %s35_s28, %s831_s16  ;;  %p837_p5 = scmp.lt.s32.totalorder %s831_s16, %s831_s16 }
   0xe   :  { %p838_p6 = por %p837_p5, %p836_p4 }
  0x10   :  { %p839_p7 = pnand %p838_p6, %p832_p3 }
  0x12   :  { %842 = shalt.err (!%p839_p7)
}
  0x13   :  { %s963_s17 = smov 64   ;;  %s964_s18 = smov 4  }
  0x14   :  { %40 = dma.hbm_to_vmem [thread:$0]  %s1176_s1, 128, %s35_s28, [#allocation6], %s963_s17, %s963_s17, %s964_s18  }
  0x15   :  { %s843_s23 = scalar_lea.hbm %s1179_s4, 1024 }
  0x16   :  { %p844_p8 = scmp.ne.s32.totalorder %s1179_s4, %s843_s23  ;;  %p847_p9 = scmp.lt.u32.totalorder %s843_s23, %s1179_s4 }
  0x18   :  { %p849_p10 = pnand %p847_p9, %p844_p8 }
  0x1a   :  { %852 = shalt.err (!%p849_p10)
}
  0x1b   :  { %s853_s29 = scalar_lea.vmem %s1018_s30, 1024  ;;  %p858_p12 = scmp.lt.s32.totalorder %s1018_s30, %s1018_s30 }
  0x1c   :  { %p854_p11 = scmp.ne.s32.totalorder %s1018_s30, %s853_s29  ;;  %p859_p13 = scmp.lt.s32.totalorder %s853_s29, %s853_s29 }
  0x1e   :  { %p860_p0 = por %p859_p13, %p858_p12 }
  0x20   :  { %p861_p1 = pnand %p860_p0, %p854_p11 }
  0x22   :  { %864 = shalt.err (!%p861_p1)
}
  0x23   :  { %66 = dma.hbm_to_vmem [thread:$0]  %s1179_s4, 1024, %s1018_s30, [#allocation9], %s963_s17, %s963_s17, %s964_s18  }
  0x24   :  { %s965_s9 = smov [#allocation2]   ;;  %s966_s11 = smov [#allocation7]  }
  0x25   :  { %s22_s10 = sshll.u32 %s965_s9, 4  ;;  %s46_s12 = sshll.u32 %s966_s11, 4  ;;  %s23_s10 = int_to_ptr.vmem [resolvable:$true] %s22_s10  ;;  %s1055_s12 = int_to_ptr.vmem [resolvable:$true] %s46_s12 }
  0x26   :  { %s865_s15 = scalar_lea.hbm %s1175_s0, 128 }
  0x27   :  { %p866_p2 = scmp.ne.s32.totalorder %s1175_s0, %s865_s15  ;;  %p869_p3 = scmp.lt.u32.totalorder %s865_s15, %s1175_s0 }
  0x29   :  { %p871_p4 = pnand %p869_p3, %p866_p2 }
  0x2b   :  { %874 = shalt.err (!%p871_p4)
}
  0x2c   :  { %s875_s4 = scalar_lea.vmem %s23_s10, 128  ;;  %p880_p6 = scmp.lt.s32.totalorder %s23_s10, %s23_s10 }
  0x2d   :  { %p876_p5 = scmp.ne.s32.totalorder %s23_s10, %s875_s4  ;;  %p881_p7 = scmp.lt.s32.totalorder %s875_s4, %s875_s4 }
  0x2f   :  { %p882_p8 = por %p881_p7, %p880_p6 }
  0x31   :  { %p883_p9 = pnand %p882_p8, %p876_p5 }
  0x33   :  { %886 = shalt.err (!%p883_p9)
}
  0x34   :  { %28 = dma.hbm_to_vmem [thread:$0]  %s1175_s0, 128, %s23_s10, [#allocation3], %s963_s17, %s963_s17, %s964_s18  }
  0x35   :  { %s887_s25 = scalar_lea.hbm %s1177_s2, 1024 }
  0x36   :  { %p888_p10 = scmp.ne.s32.totalorder %s1177_s2, %s887_s25  ;;  %p891_p11 = scmp.lt.u32.totalorder %s887_s25, %s1177_s2 }
  0x38   :  { %p893_p12 = pnand %p891_p11, %p888_p10 }
  0x3a   :  { %896 = shalt.err (!%p893_p12)
}
  0x3b   :  { %s897_s28 = scalar_lea.vmem %s1055_s12, 1024  ;;  %p902_p0 = scmp.lt.s32.totalorder %s1055_s12, %s1055_s12 }
  0x3c   :  { %p898_p13 = scmp.ne.s32.totalorder %s1055_s12, %s897_s28  ;;  %p903_p1 = scmp.lt.s32.totalorder %s897_s28, %s897_s28 }
  0x3e   :  { %p904_p2 = por %p903_p1, %p902_p0 }
  0x40   :  { %p905_p3 = pnand %p904_p2, %p898_p13 }
  0x42   :  { %908 = shalt.err (!%p905_p3)
}
  0x43   :  { %52 = dma.hbm_to_vmem [thread:$0]  %s1177_s2, 1024, %s1055_s12, [#allocation6], %s963_s17, %s963_s17, %s964_s18  }
  0x44   :  { %s967_s10 = smov [#allocation10]   ;;  %s909_s15 = scalar_lea.hbm %s1181_s6, 1024 }
  0x45   :  { %s74_s11 = sshll.u32 %s967_s10, 4  ;;  %p910_p4 = scmp.ne.s32.totalorder %s1181_s6, %s909_s15  ;;  %s75_s11 = int_to_ptr.vmem [resolvable:$true] %s74_s11 }
  0x46   :  { %p913_p5 = scmp.lt.u32.totalorder %s909_s15, %s1181_s6 }
  0x48   :  { %p915_p6 = pnand %p913_p5, %p910_p4 }
  0x4a   :  { %918 = shalt.err (!%p915_p6)
}
  0x4b   :  { %s919_s4 = scalar_lea.vmem %s75_s11, 1024  ;;  %p924_p8 = scmp.lt.s32.totalorder %s75_s11, %s75_s11 }
  0x4c   :  { %p920_p7 = scmp.ne.s32.totalorder %s75_s11, %s919_s4  ;;  %p925_p9 = scmp.lt.s32.totalorder %s919_s4, %s919_s4 }
  0x4e   :  { %p926_p10 = por %p925_p9, %p924_p8 }
  0x50   :  { %p927_p11 = pnand %p926_p10, %p920_p7 }
  0x52   :  { %930 = shalt.err (!%p927_p11)
}
  0x53   :  { %80 = dma.hbm_to_vmem [thread:$0]  %s1181_s6, 1024, %s75_s11, [#allocation9], %s963_s17, %s963_s17, %s964_s18  }
  0x54   :  { %953 = dma.done.wait [#allocation3], 128  }
  0x55   :  { %954 = vsyncadd [#allocation3], 4294967168 }
  0x56   :  { %955 = dma.done.wait [#allocation6], 1152  }
  0x57   :  { %956 = vsyncadd [#allocation6], 4294966144 }
  0x58   :  { %957 = dma.done.wait [#allocation9], 2048  }
  0x59   :  { %958 = vsyncadd [#allocation9], 4294965248  ;;  %v968_v0 = vmov 0.0   ;;  %vm969_vm0 = vmmov 0   ;;  %v787_v1 = vld [vmem:[#allocation7] sm:$0xff]   ;;  %v788_v2 = vld [vmem:[#allocation7 + $0x8] sm:$0xff]   ;;  %v586_v62 = vlaneseq }
  0x5a   :  { %697 = vmatprep.subr.bf16.mxu0 %v968_v0  ;;  %713 = vmatprep.mubr.msk.bf16.mxu0 %vm969_vm0, %v968_v0  ;;  %v789_v3 = vld [vmem:[#allocation7 + $0x10] sm:$0xff]   ;;  %v790_v4 = vld [vmem:[#allocation7 + $0x18] sm:$0xff]   ;;  %v791_v5 = vld [vmem:[#allocation7 + $0x20] sm:$0xff]   ;;  %vm227_vm1 = vcmask 130048  }
  0x5b   :  { %723 = vmatprep.subr.bf16.mxu1 %v968_v0  ;;  %739 = vmatprep.mubr.msk.bf16.mxu1 %vm969_vm0, %v968_v0  ;;  %v792_v6 = vld [vmem:[#allocation7 + $0x28] sm:$0xff]   ;;  %v793_v7 = vld [vmem:[#allocation7 + $0x30] sm:$0xff]   ;;  %v794_v8 = vld [vmem:[#allocation7 + $0x38] sm:$0xff]   ;;  %v587_v63 = vand.u32 127, %v586_v62 }
  0x5c   :  { %698 = vmatpush3.bf16.msra.mxu0 %v787_v1  ;;  %v795_v9 = vld [vmem:[#allocation5] sm:$0xff]   ;;  %v797_v10 = vld [vmem:[#allocation8] sm:$0xff]   ;;  %v798_v11 = vld [vmem:[#allocation8 + $0x8] sm:$0xff]  }
  0x5d   :  { %699 = vmatprep.subr.bf16.mxu0 %v968_v0  ;;  %724 = vmatpush3.bf16.msra.mxu1 %v797_v10  ;;  %v799_v12 = vld [vmem:[#allocation8 + $0x10] sm:$0xff]   ;;  %v800_v13 = vld [vmem:[#allocation8 + $0x18] sm:$0xff]   ;;  %v801_v14 = vld [vmem:[#allocation8 + $0x20] sm:$0xff]   ;;  %vm588_vm2 = vcmp.lt.s32.totalorder %v587_v63, 8 }
  0x5e   :  { %725 = vmatprep.subr.bf16.mxu1 %v968_v0  ;;  %v802_v15 = vld [vmem:[#allocation8 + $0x28] sm:$0xff]   ;;  %v1129_v21 = vld [vmem:[#allocation2] sm:$0xff]   ;;  %v804_v23 = vld [vmem:[#allocation8 + $0x38] sm:$0xff]  }
  0x5f   :  { %v803_v22 = vld [vmem:[#allocation8 + $0x30] sm:$0xff]   ;;  %v805_v34 = vld [vmem:[#allocation10] sm:$0xff]   ;;  %v806_v35 = vld [vmem:[#allocation10 + $0x8] sm:$0xff]  }
  0x60   :  { %700 = vmatpush3.bf16.msra.mxu0 %v788_v2  ;;  %v641_v24 = vld [vmem:[%s1178_s3] ss:$0 sm:$0xff]  ;;  %v808_v37 = vld [vmem:[#allocation10 + $0x18] sm:$0xff]   ;;  %v809_v38 = vld [vmem:[#allocation10 + $0x20] sm:$0xff]  }
  0x61   :  { %701 = vmatprep.subr.bf16.mxu0 %v968_v0  ;;  %726 = vmatpush3.bf16.msra.mxu1 %v798_v11  ;;  %v807_v36 = vld [vmem:[#allocation10 + $0x10] sm:$0xff]   ;;  %v810_v39 = vld [vmem:[#allocation10 + $0x28] sm:$0xff]   ;;  %v812_v46 = vld [vmem:[#allocation10 + $0x38] sm:$0xff]  }
  0x62   :  { %727 = vmatprep.subr.bf16.mxu1 %v968_v0  ;;  %v811_v45 = vld [vmem:[#allocation10 + $0x30] sm:$0xff]  }
  0x63   :  { %v652_v47 = vld [vmem:[%s1180_s5] ss:$0 sm:$0xff] }
  0x64   :  { %702 = vmatpush3.bf16.msra.mxu0 %v789_v3 }
  0x65   :  { %703 = vmatprep.subr.bf16.mxu0 %v968_v0  ;;  %728 = vmatpush3.bf16.msra.mxu1 %v799_v12 }
  0x66   :  { %729 = vmatprep.subr.bf16.mxu1 %v968_v0 }
  0x68   :  { %704 = vmatpush3.bf16.msra.mxu0 %v790_v4 }
  0x69   :  { %705 = vmatprep.subr.bf16.mxu0 %v968_v0  ;;  %730 = vmatpush3.bf16.msra.mxu1 %v800_v13 }
  0x6a   :  { %731 = vmatprep.subr.bf16.mxu1 %v968_v0 }
  0x6c   :  { %706 = vmatpush3.bf16.msra.mxu0 %v791_v5 }
  0x6d   :  { %707 = vmatprep.subr.bf16.mxu0 %v968_v0  ;;  %732 = vmatpush3.bf16.msra.mxu1 %v801_v14 }
  0x6e   :  { %733 = vmatprep.subr.bf16.mxu1 %v968_v0 }
  0x70   :  { %708 = vmatpush3.bf16.msra.mxu0 %v792_v6 }
  0x71   :  { %709 = vmatprep.subr.bf16.mxu0 %v968_v0  ;;  %734 = vmatpush3.bf16.msra.mxu1 %v802_v15 }
  0x72   :  { %735 = vmatprep.subr.bf16.mxu1 %v968_v0 }
  0x74   :  { %710 = vmatpush3.bf16.msra.mxu0 %v793_v7 }
  0x75   :  { %711 = vmatprep.subr.bf16.mxu0 %v968_v0  ;;  %736 = vmatpush3.bf16.msra.mxu1 %v803_v22 }
  0x76   :  { %737 = vmatprep.subr.bf16.mxu1 %v968_v0 }
  0x78   :  { %712 = vmatpush3.bf16.msra.mxu0 %v794_v8 }
  0x79   :  { %717 = vmatprep.subr.bf16.mxu0 %v968_v0  ;;  %738 = vmatpush3.bf16.msra.mxu1 %v804_v23 }
  0x7a   :  { %749 = vmatprep.subr.bf16.mxu1 %v968_v0 }
  0x7b   :  { %714 = vmatmul.mubr.bf16.vlgmr.msra.gmra.mrb[0].mxu0 %v795_v9 }
  0x7c   :  { %719 = vmatprep.mubr.msk.bf16.mxu0 %vm969_vm0, %v968_v0 }
 0x14e   :  { %v207_v16 = vpop.f32.mrb[0].mxu0 }
 0x14f   :  { %v715_v17 = vpop.f32.mrb[1].mxu0 }
 0x150   :  { %v210_v18 = vpop.f32.mrb[2].mxu0 }
 0x151   :  { %v214_v19 = vpack.c.bf16 %v210_v18, %v207_v16  ;;  %v716_v20 = vpop.f32.mrb[3].mxu0 }
 0x153   :  { %718 = vmatpush3.bf16.msra.mxu0 %v214_v19 }
 0x154   :  { %743 = vmatprep.subr.bf16.mxu0 %v968_v0 }
 0x156   :  { %720 = vmatmul.mubr.msk.bf16.vlgmr.msra.gmra.mrb[4].mxu0 %vm227_vm1, %v1129_v21 }
 0x157   :  { %745 = vmatprep.mubr.msk.bf16.mxu0 %vm969_vm0, %v968_v0 }
 0x229   :  { %v265_v25 = vpop.f32.mrb[4].mxu0 }
 0x22a   :  { %v266_v26 = vadd.f32 %v641_v24, %v265_v25  ;;  %v721_v27 = vpop.f32.mrb[5].mxu0 }
 0x22b   :  { %v268_v28 = vpop.f32.mrb[6].mxu0 }
 0x22c   :  { %v269_v29 = vadd.f32 %v641_v24, %v268_v28  ;;  %v722_v30 = vpop.f32.mrb[7].mxu0  ;;  %v272_v31 = vmax.f32 %v266_v26, 0.0 }
 0x22e   :  { %v273_v32 = vmax.f32 %v269_v29, 0.0 }
 0x230   :  { %v274_v33 = vpack.c.bf16 %v273_v32, %v272_v31 }
 0x232   :  { %740 = vmatmul.mubr.bf16.vlgmr.msra.gmra.mrb[0].mxu1 %v274_v33 }
 0x233   :  { %765 = vmatprep.mubr.msk.bf16.mxu1 %vm969_vm0, %v968_v0  ;;  %750 = vmatpush3.bf16.msra.mxu1 %v805_v34 }
 0x234   :  { %751 = vmatprep.subr.bf16.mxu1 %v968_v0 }
 0x237   :  { %752 = vmatpush3.bf16.msra.mxu1 %v806_v35 }
 0x238   :  { %753 = vmatprep.subr.bf16.mxu1 %v968_v0 }
 0x23b   :  { %754 = vmatpush3.bf16.msra.mxu1 %v807_v36 }
 0x23c   :  { %755 = vmatprep.subr.bf16.mxu1 %v968_v0 }
 0x23f   :  { %756 = vmatpush3.bf16.msra.mxu1 %v808_v37 }
 0x240   :  { %757 = vmatprep.subr.bf16.mxu1 %v968_v0 }
 0x243   :  { %758 = vmatpush3.bf16.msra.mxu1 %v809_v38 }
 0x244   :  { %759 = vmatprep.subr.bf16.mxu1 %v968_v0 }
 0x247   :  { %760 = vmatpush3.bf16.msra.mxu1 %v810_v39 }
 0x248   :  { %761 = vmatprep.subr.bf16.mxu1 %v968_v0 }
 0x24b   :  { %762 = vmatpush3.bf16.msra.mxu1 %v811_v45 }
 0x24c   :  { %763 = vmatprep.subr.bf16.mxu1 %v968_v0 }
 0x24f   :  { %764 = vmatpush3.bf16.msra.mxu1 %v812_v46 }
 0x305   :  { %v373_v40 = vpop.f32.mrb[0].mxu1 }
 0x306   :  { %v741_v41 = vpop.f32.mrb[1].mxu1 }
 0x307   :  { %v376_v42 = vpop.f32.mrb[2].mxu1 }
 0x308   :  { %v380_v43 = vpack.c.bf16 %v376_v42, %v373_v40  ;;  %v742_v44 = vpop.f32.mrb[3].mxu1 }
 0x30a   :  { %744 = vmatpush3.bf16.msra.mxu0 %v380_v43 }
 0x30b   :  { %769 = vmatprep.subr.bf16.mxu0 %v968_v0 }
 0x30d   :  { %746 = vmatmul.mubr.msk.bf16.vlgmr.msra.gmra.mrb[8].mxu0 %vm227_vm1, %v1129_v21 }
 0x30e   :  { %771 = vmatprep.mubr.msk.bf16.mxu0 %vm969_vm0, %v968_v0  ;;  %v662_v0 = vld [vmem:[%s1182_s7] ss:$0 sm:$0xff]  ;;  %s970_s7 = smov [#allocation11]  }
 0x30f   :  { %s618_s22 = sshll.u32 %s970_s7, 4  ;;  %s619_s22 = int_to_ptr.vmem [resolvable:$true] %s618_s22 }
 0x310   :  { %s931_s23 = scalar_lea.vmem %s619_s22, 256  ;;  %p936_p13 = scmp.lt.s32.totalorder %s619_s22, %s619_s22 }
 0x311   :  { %p932_p12 = scmp.ne.s32.totalorder %s619_s22, %s931_s23  ;;  %p937_p0 = scmp.lt.s32.totalorder %s931_s23, %s931_s23 }
 0x313   :  { %p938_p1 = por %p937_p0, %p936_p13 }
 0x315   :  { %p939_p2 = pnand %p938_p1, %p932_p12 }
 0x3e0   :  { %v422_v48 = vpop.f32.mrb[8].mxu0 }
 0x3e1   :  { %v423_v49 = vadd.f32 %v652_v47, %v422_v48  ;;  %v747_v50 = vpop.f32.mrb[9].mxu0 }
 0x3e2   :  { %v425_v51 = vpop.f32.mrb[10].mxu0 }
 0x3e3   :  { %v426_v52 = vadd.f32 %v652_v47, %v425_v51  ;;  %v748_v53 = vpop.f32.mrb[11].mxu0  ;;  %v429_v54 = vmax.f32 %v423_v49, 0.0 }
 0x3e5   :  { %v430_v55 = vmax.f32 %v426_v52, 0.0 }
 0x3e7   :  { %v431_v56 = vpack.c.bf16 %v430_v55, %v429_v54 }
 0x3e9   :  { %766 = vmatmul.mubr.bf16.vlgmr.msra.gmra.mrb[4].mxu1 %v431_v56 }
 0x4bc   :  { %v530_v57 = vpop.f32.mrb[4].mxu1 }
 0x4bd   :  { %v767_v58 = vpop.f32.mrb[5].mxu1 }
 0x4be   :  { %v533_v59 = vpop.f32.mrb[6].mxu1 }
 0x4bf   :  { %v537_v60 = vpack.c.bf16 %v533_v59, %v530_v57  ;;  %v768_v61 = vpop.f32.mrb[7].mxu1 }
 0x4c1   :  { %770 = vmatpush3.bf16.msra.mxu0 %v537_v60 }
 0x4c4   :  { %772 = vmatmul.mubr.msk.bf16.vlgmr.msra.gmra.mrb[12].mxu0 %vm227_vm1, %v1129_v21 }
 0x597   :  { %v579_v1 = vpop.f32.mrb[12].mxu0 }
 0x598   :  { %v580_v2 = vadd.f32 %v662_v0, %v579_v1  ;;  %v773_v3 = vpop.f32.mrb[13].mxu0 }
 0x599   :  { %v582_v4 = vpop.f32.mrb[14].mxu0 }
 0x59a   :  { %v589_v5 = vsel %vm588_vm2, %v580_v2, -1e+30  ;;  %v583_v6 = vadd.f32 %v662_v0, %v582_v4  ;;  %v774_v7 = vpop.f32.mrb[15].mxu0 }
 0x59b   :  { %591 = vmax.xlane.f32.xlu0 %v589_v5 }
 0x59c   :  { %v590_v8 = vsel %vm588_vm2, %v583_v6, -1e+30 }
 0x59f   :  { %593 = vmax.xlane.f32.xlu0 %v590_v8 }
 0x628   :  { %v592_v9 = vpop.xlane.xlu0 %591 }
 0x629   :  { %v595_v10 = vsub.f32 %v589_v5, %v592_v9 }
 0x62b   :  { %v597_v11 = vmul.f32 1.442695, %v595_v10 }
 0x62c   :  { %v594_v12 = vpop.xlane.xlu0 %593 }
 0x62d   :  { %v596_v13 = vsub.f32 %v590_v8, %v594_v12  ;;  %813 = vpow2.f32 %v597_v11 }
 0x62f   :  { %v599_v14 = vmul.f32 1.442695, %v596_v13 }
 0x631   :  { %815 = vpow2.f32 %v599_v14 }
 0x637   :  { %v814_v15 = vpop.eup %813 }
 0x638   :  { %601 = vadd.xlane.f32.xlu1 %v814_v15 }
 0x63b   :  { %v816_v16 = vpop.eup %815 }
 0x63c   :  { %603 = vadd.xlane.f32.xlu1 %v816_v16 }
 0x6c5   :  { %v602_v17 = vpop.xlane.xlu1 %601 }
 0x6c6   :  { %817 = vlog2.f32 %v602_v17 }
 0x6c9   :  { %v604_v18 = vpop.xlane.xlu1 %603 }
 0x6ca   :  { %819 = vlog2.f32 %v604_v18 }
 0x6d0   :  { %v818_v19 = vpop.eup %817 }
 0x6d1   :  { %v606_v20 = vmul.f32 0.6931472, %v818_v19 }
 0x6d3   :  { %v609_v21 = vsub.f32 %v595_v10, %v606_v20 }
 0x6d4   :  { %v820_v22 = vpop.eup %819 }
 0x6d5   :  { %611 = vst [vmem:[#allocation11] sm:$0xff] %v609_v21  ;;  %v608_v23 = vmul.f32 0.6931472, %v820_v22 }
 0x6d7   :  { %v610_v24 = vsub.f32 %v596_v13, %v608_v23 }
 0x6d9   :  { %612 = vst [vmem:[#allocation11 + $0x8] sm:$0xff] %v610_v24 }
 0x6da   :  { %942 = shalt.err (!%p939_p2)
}
 0x6db   :  { %s943_s26 = scalar_lea.hbm %s1183_s8, 256 }
 0x6dc   :  { %p944_p3 = scmp.ne.s32.totalorder %s1183_s8, %s943_s26  ;;  %p947_p4 = scmp.lt.u32.totalorder %s943_s26, %s1183_s8 }
 0x6de   :  { %p949_p5 = pnand %p947_p4, %p944_p3 }
 0x6e0   :  { %952 = shalt.err (!%p949_p5)
}
 0x6e1   :  { %s971_s0 = smov 128   ;;  %s972_s9 = smov 8  }
 0x6e2   :  { %624 = dma.vmem_to_hbm [thread:$0]  %s619_s22, 256, %s1183_s8, [#allocation4], %s971_s0, %s971_s0, %s972_s9  }
 0x6e3   :  { %959 = dma.done.wait [#allocation4], 256  }
 0x6e4   :  { %960 = vsyncadd [#allocation4], 4294967040 }
 0x6e5   :  { %628 = vsyncpa [#allocation3], 1 }
 0x6e6   :  { %629 = vsyncpa [#allocation6], 1 }
 0x6e7   :  { %630 = vsyncpa [#allocation9], 1 }
 0x6e8   :  { %631 = vsyncpa [#allocation4], 1 }

</bundles_post_ra>
